<compile_context>
chip_gen: v5e
topology: v5e:2x2
jax: 0.10.0
libtpu: 0.0.40
codegen_flags: <defaults>
</compile_context>

<pallas_src>
import math
import jax
import jax.numpy as jnp
from jax import lax
from jax.experimental import pallas as pl
from jax.experimental.pallas import tpu as pltpu


def make_mha_kernel(num_heads: int, d_k: int):
    scale = 1.0 / math.sqrt(d_k)
    qkT_dims = (((1,), (1,)), ((), ()))     # contract the d_k axes: q @ k^T

    def mha_kernel(xq_ref, xk_ref, xv_ref,
                   wq_ref, bq_ref, wk_ref, bk_ref, wv_ref, bv_ref,
                   wo_ref, bo_ref,
                   o_ref):
        # One grid step == one batch element; activation refs are (1, S, D).
        x_q = xq_ref[0]            # (S, D)
        x_k = xk_ref[0]            # (S, D)
        x_v = xv_ref[0]            # (S, D)

        acc = jnp.zeros(x_q.shape, jnp.float32)   # (S, D) output accumulator

        # Heads statically unrolled (H is small). All matmuls are 2-D, operate
        # on head-major pre-split weights, and never relayout activations.
        for h in range(num_heads):
            q_h = jnp.dot(x_q, wq_ref[h],
                          preferred_element_type=jnp.float32) + bq_ref[h]   # (S, d_k)
            q_h = q_h * scale
            k_h = jnp.dot(x_k, wk_ref[h],
                          preferred_element_type=jnp.float32) + bk_ref[h]   # (S, d_k)
            v_h = jnp.dot(x_v, wv_ref[h],
                          preferred_element_type=jnp.float32) + bv_ref[h]   # (S, d_k)

            # scores = q_h @ k_h^T, contracting the d_k dims directly.
            s = lax.dot_general(q_h, k_h, qkT_dims,
                                preferred_element_type=jnp.float32)         # (S, S)
            s = s - jnp.max(s, axis=-1, keepdims=True)
            p = jnp.exp(s)
            p = p * pl.reciprocal(jnp.sum(p, axis=-1, keepdims=True), approx=True)

            ctx = jnp.dot(p, v_h, preferred_element_type=jnp.float32)       # (S, d_k)
            # Fold this head directly into the output projection: lane-dense (S, D).
            acc = acc + jnp.dot(ctx, wo_ref[h], preferred_element_type=jnp.float32)

        out = acc + bo_ref[...]
        o_ref[0] = out.astype(o_ref.dtype)

    return mha_kernel


def multi_headed_attention(query, key, value, params, *, num_heads):
    """query/key/value: (B, S, D) float32. params: dict of weights/biases."""
    B, S, D = query.shape
    assert D % num_heads == 0
    d_k = D // num_heads

    # Host-side (free) weight re-layout so the kernel never transposes/slices:
    #   Wq/Wk/Wv (D, D)  ->  W^T split per output head  ->  (H, D, d_k)
    #   Wo       (D, D)  ->  W^T split per input head   ->  (H, d_k, D)
    def split_in_proj(w):
        return jnp.transpose(w.T.reshape(D, num_heads, d_k), (1, 0, 2))

    wq3 = split_in_proj(params["wq"])
    wk3 = split_in_proj(params["wk"])
    wv3 = split_in_proj(params["wv"])
    wo3 = params["wo"].T.reshape(num_heads, d_k, D)
    bq3 = params["bq"].reshape(num_heads, 1, d_k)
    bk3 = params["bk"].reshape(num_heads, 1, d_k)
    bv3 = params["bv"].reshape(num_heads, 1, d_k)
    bo2 = params["bo"].reshape(1, D)

    kernel = make_mha_kernel(num_heads, d_k)

    seq_blk = pl.BlockSpec((1, S, D), lambda b: (b, 0, 0))
    w_in = pl.BlockSpec((num_heads, D, d_k), lambda b: (0, 0, 0))
    b_in = pl.BlockSpec((num_heads, 1, d_k), lambda b: (0, 0, 0))
    w_out = pl.BlockSpec((num_heads, d_k, D), lambda b: (0, 0, 0))
    b_out = pl.BlockSpec((1, D), lambda b: (0, 0))

    return pl.pallas_call(
        kernel,
        out_shape=jax.ShapeDtypeStruct((B, S, D), query.dtype),
        grid_spec=pltpu.PrefetchScalarGridSpec(
            num_scalar_prefetch=0,
            grid=(B,),
            in_specs=[seq_blk, seq_blk, seq_blk,
                      w_in, b_in,     # Wq^T per head, bq
                      w_in, b_in,     # Wk^T per head, bk
                      w_in, b_in,     # Wv^T per head, bv
                      w_out, b_out],  # Wo^T per head, bo
            out_specs=seq_blk,
        ),
        compiler_params=pltpu.CompilerParams(
            dimension_semantics=("parallel",)),
    )(query, key, value, wq3, bq3, wk3, bk3, wv3, bv3, wo3, bo2)


def reference_mha(query, key, value, params, *, num_heads):
    """Pure-JAX reference matching the PyTorch forward."""
    B, S, D = query.shape
    d_k = D // num_heads

    def lin(x, w, b):
        return x @ w.T + b

    q = lin(query, params["wq"], params["bq"]).reshape(B, S, num_heads, d_k).transpose(0, 2, 1, 3)
    k = lin(key,   params["wk"], params["bk"]).reshape(B, S, num_heads, d_k).transpose(0, 2, 1, 3)
    v = lin(value, params["wv"], params["bv"]).reshape(B, S, num_heads, d_k).transpose(0, 2, 1, 3)
    scores = jnp.einsum("bhqd,bhkd->bhqk", q, k) / math.sqrt(d_k)
    p = jax.nn.softmax(scores, axis=-1)
    x = jnp.einsum("bhqk,bhkd->bhqd", p, v).transpose(0, 2, 1, 3).reshape(B, S, D)
    return lin(x, params["wo"], params["bo"])


if __name__ == "__main__":
    B, S, D, H = 2, 8, 32, 4

    key0 = jax.random.PRNGKey(0)
    keys = jax.random.split(key0, 12)

    bound = 1.0 / math.sqrt(D)   # nn.Linear default init range
    params = {
        "wq": jax.random.uniform(keys[0], (D, D), jnp.float32, -bound, bound),
        "bq": jax.random.uniform(keys[1], (1, D), jnp.float32, -bound, bound),
        "wk": jax.random.uniform(keys[2], (D, D), jnp.float32, -bound, bound),
        "bk": jax.random.uniform(keys[3], (1, D), jnp.float32, -bound, bound),
        "wv": jax.random.uniform(keys[4], (D, D), jnp.float32, -bound, bound),
        "bv": jax.random.uniform(keys[5], (1, D), jnp.float32, -bound, bound),
        "wo": jax.random.uniform(keys[6], (D, D), jnp.float32, -bound, bound),
        "bo": jax.random.uniform(keys[7], (1, D), jnp.float32, -bound, bound),
    }

    query = jax.random.normal(keys[8], (B, S, D), jnp.float32)
    key_t = jax.random.normal(keys[9], (B, S, D), jnp.float32)
    value = jax.random.normal(keys[10], (B, S, D), jnp.float32)

    out = multi_headed_attention(query, key_t, value, params, num_heads=H)
    out = jax.block_until_ready(out)

    ref = reference_mha(query, key_t, value, params, num_heads=H)
    assert out.shape == (B, S, D)
    # approx=True reciprocal (EUP vrcp) for the softmax denominator: allow a
    # slightly looser tolerance than exact-division f32.
    assert jnp.allclose(out, ref, atol=2e-3, rtol=2e-3), "mismatch vs reference"

    print("KERNEL_OK")
</pallas_src>

<mosaic_0001>
module attributes {stable_mosaic.version = 11 : i64} {
  func.func @mha_kernel(%arg0: i32, %arg1: memref<1x8x32xf32, #tpu.memory_space<vmem>>, %arg2: memref<1x8x32xf32, #tpu.memory_space<vmem>>, %arg3: memref<1x8x32xf32, #tpu.memory_space<vmem>>, %arg4: memref<4x32x8xf32, #tpu.memory_space<vmem>>, %arg5: memref<4x1x8xf32, #tpu.memory_space<vmem>>, %arg6: memref<4x32x8xf32, #tpu.memory_space<vmem>>, %arg7: memref<4x1x8xf32, #tpu.memory_space<vmem>>, %arg8: memref<4x32x8xf32, #tpu.memory_space<vmem>>, %arg9: memref<4x1x8xf32, #tpu.memory_space<vmem>>, %arg10: memref<4x8x32xf32, #tpu.memory_space<vmem>>, %arg11: memref<1x32xf32, #tpu.memory_space<vmem>>, %arg12: memref<1x8x32xf32, #tpu.memory_space<vmem>>) attributes {dimension_semantics = [#tpu.dimension_semantics<parallel>], iteration_bounds = array<i64: 2>, scalar_prefetch = 0 : i64, scratch_operands = 0 : i64, tpu.core_type = #tpu.core_type<tc>, window_params = [{transform_indices = @transform_0, window_bounds = array<i64: 1, 8, 32>}, {transform_indices = @transform_1, window_bounds = array<i64: 1, 8, 32>}, {transform_indices = @transform_2, window_bounds = array<i64: 1, 8, 32>}, {pipeline_mode = #tpu.pipeline_mode<synchronous>, transform_indices = @transform_3, window_bounds = array<i64: 4, 32, 8>}, {pipeline_mode = #tpu.pipeline_mode<synchronous>, transform_indices = @transform_4, window_bounds = array<i64: 4, 1, 8>}, {pipeline_mode = #tpu.pipeline_mode<synchronous>, transform_indices = @transform_5, window_bounds = array<i64: 4, 32, 8>}, {pipeline_mode = #tpu.pipeline_mode<synchronous>, transform_indices = @transform_6, window_bounds = array<i64: 4, 1, 8>}, {pipeline_mode = #tpu.pipeline_mode<synchronous>, transform_indices = @transform_7, window_bounds = array<i64: 4, 32, 8>}, {pipeline_mode = #tpu.pipeline_mode<synchronous>, transform_indices = @transform_8, window_bounds = array<i64: 4, 1, 8>}, {pipeline_mode = #tpu.pipeline_mode<synchronous>, transform_indices = @transform_9, window_bounds = array<i64: 4, 8, 32>}, {pipeline_mode = #tpu.pipeline_mode<synchronous>, transform_indices = @transform_10, window_bounds = array<i64: 1, 32>}, {transform_indices = @transform_11, window_bounds = array<i64: 1, 8, 32>}]} {
    %c0 = arith.constant 0 : index
    %c0_0 = arith.constant 0 : index
    %c0_1 = arith.constant 0 : index
    %0 = vector.load %arg1[%c0, %c0_0, %c0_1] : memref<1x8x32xf32, #tpu.memory_space<vmem>>, vector<1x8x32xf32>
    %1 = vector.shape_cast %0 : vector<1x8x32xf32> to vector<8x32xf32>
    %c0_2 = arith.constant 0 : index
    %c0_3 = arith.constant 0 : index
    %c0_4 = arith.constant 0 : index
    %2 = vector.load %arg2[%c0_2, %c0_3, %c0_4] : memref<1x8x32xf32, #tpu.memory_space<vmem>>, vector<1x8x32xf32>
    %3 = vector.shape_cast %2 : vector<1x8x32xf32> to vector<8x32xf32>
    %c0_5 = arith.constant 0 : index
    %c0_6 = arith.constant 0 : index
    %c0_7 = arith.constant 0 : index
    %4 = vector.load %arg3[%c0_5, %c0_6, %c0_7] : memref<1x8x32xf32, #tpu.memory_space<vmem>>, vector<1x8x32xf32>
    %5 = vector.shape_cast %4 : vector<1x8x32xf32> to vector<8x32xf32>
    %cst = arith.constant 0.000000e+00 : f32
    %6 = vector.broadcast %cst : f32 to vector<8x32xf32>
    %c0_8 = arith.constant 0 : index
    %c0_9 = arith.constant 0 : index
    %c0_10 = arith.constant 0 : index
    %7 = vector.load %arg4[%c0_8, %c0_9, %c0_10] : memref<4x32x8xf32, #tpu.memory_space<vmem>>, vector<1x32x8xf32>
    %8 = vector.shape_cast %7 : vector<1x32x8xf32> to vector<32x8xf32>
    %cst_11 = arith.constant dense<0.000000e+00> : vector<8x8xf32>
    %9 = tpu.matmul %1, %8, %cst_11 {dimension_numbers = #tpu.dot_dimension_numbers<[1], [0], [0], [1], [0, 0, 1, 1], [], []>} : vector<8x32xf32>, vector<32x8xf32>, vector<8x8xf32> -> vector<8x8xf32>
    %c0_12 = arith.constant 0 : index
    %c0_13 = arith.constant 0 : index
    %c0_14 = arith.constant 0 : index
    %10 = vector.load %arg5[%c0_12, %c0_13, %c0_14] : memref<4x1x8xf32, #tpu.memory_space<vmem>>, vector<1x1x8xf32>
    %11 = vector.shape_cast %10 : vector<1x1x8xf32> to vector<1x8xf32>
    %12 = vector.broadcast %11 : vector<1x8xf32> to vector<8x8xf32>
    %13 = arith.addf %9, %12 : vector<8x8xf32>
    %cst_15 = arith.constant 0.353553385 : f32
    %14 = vector.broadcast %cst_15 : f32 to vector<8x8xf32>
    %15 = arith.mulf %13, %14 : vector<8x8xf32>
    %c0_16 = arith.constant 0 : index
    %c0_17 = arith.constant 0 : index
    %c0_18 = arith.constant 0 : index
    %16 = vector.load %arg6[%c0_16, %c0_17, %c0_18] : memref<4x32x8xf32, #tpu.memory_space<vmem>>, vector<1x32x8xf32>
    %17 = vector.shape_cast %16 : vector<1x32x8xf32> to vector<32x8xf32>
    %cst_19 = arith.constant dense<0.000000e+00> : vector<8x8xf32>
    %18 = tpu.matmul %3, %17, %cst_19 {dimension_numbers = #tpu.dot_dimension_numbers<[1], [0], [0], [1], [0, 0, 1, 1], [], []>} : vector<8x32xf32>, vector<32x8xf32>, vector<8x8xf32> -> vector<8x8xf32>
    %c0_20 = arith.constant 0 : index
    %c0_21 = arith.constant 0 : index
    %c0_22 = arith.constant 0 : index
    %19 = vector.load %arg7[%c0_20, %c0_21, %c0_22] : memref<4x1x8xf32, #tpu.memory_space<vmem>>, vector<1x1x8xf32>
    %20 = vector.shape_cast %19 : vector<1x1x8xf32> to vector<1x8xf32>
    %21 = vector.broadcast %20 : vector<1x8xf32> to vector<8x8xf32>
    %22 = arith.addf %18, %21 : vector<8x8xf32>
    %c0_23 = arith.constant 0 : index
    %c0_24 = arith.constant 0 : index
    %c0_25 = arith.constant 0 : index
    %23 = vector.load %arg8[%c0_23, %c0_24, %c0_25] : memref<4x32x8xf32, #tpu.memory_space<vmem>>, vector<1x32x8xf32>
    %24 = vector.shape_cast %23 : vector<1x32x8xf32> to vector<32x8xf32>
    %cst_26 = arith.constant dense<0.000000e+00> : vector<8x8xf32>
    %25 = tpu.matmul %5, %24, %cst_26 {dimension_numbers = #tpu.dot_dimension_numbers<[1], [0], [0], [1], [0, 0, 1, 1], [], []>} : vector<8x32xf32>, vector<32x8xf32>, vector<8x8xf32> -> vector<8x8xf32>
    %c0_27 = arith.constant 0 : index
    %c0_28 = arith.constant 0 : index
    %c0_29 = arith.constant 0 : index
    %26 = vector.load %arg9[%c0_27, %c0_28, %c0_29] : memref<4x1x8xf32, #tpu.memory_space<vmem>>, vector<1x1x8xf32>
    %27 = vector.shape_cast %26 : vector<1x1x8xf32> to vector<1x8xf32>
    %28 = vector.broadcast %27 : vector<1x8xf32> to vector<8x8xf32>
    %29 = arith.addf %25, %28 : vector<8x8xf32>
    %cst_30 = arith.constant dense<0.000000e+00> : vector<8x8xf32>
    %30 = tpu.matmul %15, %22, %cst_30 {dimension_numbers = #tpu.dot_dimension_numbers<[1], [1], [0], [0], [0, 0, 1, 0], [], []>} : vector<8x8xf32>, vector<8x8xf32>, vector<8x8xf32> -> vector<8x8xf32>
    %cst_31 = arith.constant dense<0xFF800000> : vector<8xf32>
    %31 = vector.multi_reduction <maximumf>, %30, %cst_31 [1] : vector<8x8xf32> to vector<8xf32>
    %32 = vector.shape_cast %31 : vector<8xf32> to vector<8x1xf32>
    %33 = vector.broadcast %32 : vector<8x1xf32> to vector<8x8xf32>
    %34 = arith.subf %30, %33 : vector<8x8xf32>
    %35 = math.exp %34 : vector<8x8xf32>
    %cst_32 = arith.constant dense<0.000000e+00> : vector<8xf32>
    %36 = vector.multi_reduction <add>, %35, %cst_32 [1] : vector<8x8xf32> to vector<8xf32>
    %37 = vector.shape_cast %36 : vector<8xf32> to vector<8x1xf32>
    %38 = tpu.reciprocal %37 {approx = true} : vector<8x1xf32> -> vector<8x1xf32>
    %39 = vector.broadcast %38 : vector<8x1xf32> to vector<8x8xf32>
    %40 = arith.mulf %35, %39 : vector<8x8xf32>
    %cst_33 = arith.constant dense<0.000000e+00> : vector<8x8xf32>
    %41 = tpu.matmul %40, %29, %cst_33 {dimension_numbers = #tpu.dot_dimension_numbers<[1], [0], [0], [1], [0, 0, 1, 1], [], []>} : vector<8x8xf32>, vector<8x8xf32>, vector<8x8xf32> -> vector<8x8xf32>
    %c0_34 = arith.constant 0 : index
    %c0_35 = arith.constant 0 : index
    %c0_36 = arith.constant 0 : index
    %42 = vector.load %arg10[%c0_34, %c0_35, %c0_36] : memref<4x8x32xf32, #tpu.memory_space<vmem>>, vector<1x8x32xf32>
    %43 = vector.shape_cast %42 : vector<1x8x32xf32> to vector<8x32xf32>
    %cst_37 = arith.constant dense<0.000000e+00> : vector<8x32xf32>
    %44 = tpu.matmul %41, %43, %cst_37 {dimension_numbers = #tpu.dot_dimension_numbers<[1], [0], [0], [1], [0, 0, 1, 1], [], []>} : vector<8x8xf32>, vector<8x32xf32>, vector<8x32xf32> -> vector<8x32xf32>
    %45 = arith.addf %6, %44 : vector<8x32xf32>
    %c1 = arith.constant 1 : index
    %c0_38 = arith.constant 0 : index
    %c0_39 = arith.constant 0 : index
    %46 = vector.load %arg4[%c1, %c0_38, %c0_39] : memref<4x32x8xf32, #tpu.memory_space<vmem>>, vector<1x32x8xf32>
    %47 = vector.shape_cast %46 : vector<1x32x8xf32> to vector<32x8xf32>
    %cst_40 = arith.constant dense<0.000000e+00> : vector<8x8xf32>
    %48 = tpu.matmul %1, %47, %cst_40 {dimension_numbers = #tpu.dot_dimension_numbers<[1], [0], [0], [1], [0, 0, 1, 1], [], []>} : vector<8x32xf32>, vector<32x8xf32>, vector<8x8xf32> -> vector<8x8xf32>
    %c1_41 = arith.constant 1 : index
    %c0_42 = arith.constant 0 : index
    %c0_43 = arith.constant 0 : index
    %49 = vector.load %arg5[%c1_41, %c0_42, %c0_43] : memref<4x1x8xf32, #tpu.memory_space<vmem>>, vector<1x1x8xf32>
    %50 = vector.shape_cast %49 : vector<1x1x8xf32> to vector<1x8xf32>
    %51 = vector.broadcast %50 : vector<1x8xf32> to vector<8x8xf32>
    %52 = arith.addf %48, %51 : vector<8x8xf32>
    %cst_44 = arith.constant 0.353553385 : f32
    %53 = vector.broadcast %cst_44 : f32 to vector<8x8xf32>
    %54 = arith.mulf %52, %53 : vector<8x8xf32>
    %c1_45 = arith.constant 1 : index
    %c0_46 = arith.constant 0 : index
    %c0_47 = arith.constant 0 : index
    %55 = vector.load %arg6[%c1_45, %c0_46, %c0_47] : memref<4x32x8xf32, #tpu.memory_space<vmem>>, vector<1x32x8xf32>
    %56 = vector.shape_cast %55 : vector<1x32x8xf32> to vector<32x8xf32>
    %cst_48 = arith.constant dense<0.000000e+00> : vector<8x8xf32>
    %57 = tpu.matmul %3, %56, %cst_48 {dimension_numbers = #tpu.dot_dimension_numbers<[1], [0], [0], [1], [0, 0, 1, 1], [], []>} : vector<8x32xf32>, vector<32x8xf32>, vector<8x8xf32> -> vector<8x8xf32>
    %c1_49 = arith.constant 1 : index
    %c0_50 = arith.constant 0 : index
    %c0_51 = arith.constant 0 : index
    %58 = vector.load %arg7[%c1_49, %c0_50, %c0_51] : memref<4x1x8xf32, #tpu.memory_space<vmem>>, vector<1x1x8xf32>
    %59 = vector.shape_cast %58 : vector<1x1x8xf32> to vector<1x8xf32>
    %60 = vector.broadcast %59 : vector<1x8xf32> to vector<8x8xf32>
    %61 = arith.addf %57, %60 : vector<8x8xf32>
    %c1_52 = arith.constant 1 : index
    %c0_53 = arith.constant 0 : index
    %c0_54 = arith.constant 0 : index
    %62 = vector.load %arg8[%c1_52, %c0_53, %c0_54] : memref<4x32x8xf32, #tpu.memory_space<vmem>>, vector<1x32x8xf32>
    %63 = vector.shape_cast %62 : vector<1x32x8xf32> to vector<32x8xf32>
    %cst_55 = arith.constant dense<0.000000e+00> : vector<8x8xf32>
    %64 = tpu.matmul %5, %63, %cst_55 {dimension_numbers = #tpu.dot_dimension_numbers<[1], [0], [0], [1], [0, 0, 1, 1], [], []>} : vector<8x32xf32>, vector<32x8xf32>, vector<8x8xf32> -> vector<8x8xf32>
    %c1_56 = arith.constant 1 : index
    %c0_57 = arith.constant 0 : index
    %c0_58 = arith.constant 0 : index
    %65 = vector.load %arg9[%c1_56, %c0_57, %c0_58] : memref<4x1x8xf32, #tpu.memory_space<vmem>>, vector<1x1x8xf32>
    %66 = vector.shape_cast %65 : vector<1x1x8xf32> to vector<1x8xf32>
    %67 = vector.broadcast %66 : vector<1x8xf32> to vector<8x8xf32>
    %68 = arith.addf %64, %67 : vector<8x8xf32>
    %cst_59 = arith.constant dense<0.000000e+00> : vector<8x8xf32>
    %69 = tpu.matmul %54, %61, %cst_59 {dimension_numbers = #tpu.dot_dimension_numbers<[1], [1], [0], [0], [0, 0, 1, 0], [], []>} : vector<8x8xf32>, vector<8x8xf32>, vector<8x8xf32> -> vector<8x8xf32>
    %cst_60 = arith.constant dense<0xFF800000> : vector<8xf32>
    %70 = vector.multi_reduction <maximumf>, %69, %cst_60 [1] : vector<8x8xf32> to vector<8xf32>
    %71 = vector.shape_cast %70 : vector<8xf32> to vector<8x1xf32>
    %72 = vector.broadcast %71 : vector<8x1xf32> to vector<8x8xf32>
    %73 = arith.subf %69, %72 : vector<8x8xf32>
    %74 = math.exp %73 : vector<8x8xf32>
    %cst_61 = arith.constant dense<0.000000e+00> : vector<8xf32>
    %75 = vector.multi_reduction <add>, %74, %cst_61 [1] : vector<8x8xf32> to vector<8xf32>
    %76 = vector.shape_cast %75 : vector<8xf32> to vector<8x1xf32>
    %77 = tpu.reciprocal %76 {approx = true} : vector<8x1xf32> -> vector<8x1xf32>
    %78 = vector.broadcast %77 : vector<8x1xf32> to vector<8x8xf32>
    %79 = arith.mulf %74, %78 : vector<8x8xf32>
    %cst_62 = arith.constant dense<0.000000e+00> : vector<8x8xf32>
    %80 = tpu.matmul %79, %68, %cst_62 {dimension_numbers = #tpu.dot_dimension_numbers<[1], [0], [0], [1], [0, 0, 1, 1], [], []>} : vector<8x8xf32>, vector<8x8xf32>, vector<8x8xf32> -> vector<8x8xf32>
    %c1_63 = arith.constant 1 : index
    %c0_64 = arith.constant 0 : index
    %c0_65 = arith.constant 0 : index
    %81 = vector.load %arg10[%c1_63, %c0_64, %c0_65] : memref<4x8x32xf32, #tpu.memory_space<vmem>>, vector<1x8x32xf32>
    %82 = vector.shape_cast %81 : vector<1x8x32xf32> to vector<8x32xf32>
    %cst_66 = arith.constant dense<0.000000e+00> : vector<8x32xf32>
    %83 = tpu.matmul %80, %82, %cst_66 {dimension_numbers = #tpu.dot_dimension_numbers<[1], [0], [0], [1], [0, 0, 1, 1], [], []>} : vector<8x8xf32>, vector<8x32xf32>, vector<8x32xf32> -> vector<8x32xf32>
    %84 = arith.addf %45, %83 : vector<8x32xf32>
    %c2 = arith.constant 2 : index
    %c0_67 = arith.constant 0 : index
    %c0_68 = arith.constant 0 : index
    %85 = vector.load %arg4[%c2, %c0_67, %c0_68] : memref<4x32x8xf32, #tpu.memory_space<vmem>>, vector<1x32x8xf32>
    %86 = vector.shape_cast %85 : vector<1x32x8xf32> to vector<32x8xf32>
    %cst_69 = arith.constant dense<0.000000e+00> : vector<8x8xf32>
    %87 = tpu.matmul %1, %86, %cst_69 {dimension_numbers = #tpu.dot_dimension_numbers<[1], [0], [0], [1], [0, 0, 1, 1], [], []>} : vector<8x32xf32>, vector<32x8xf32>, vector<8x8xf32> -> vector<8x8xf32>
    %c2_70 = arith.constant 2 : index
    %c0_71 = arith.constant 0 : index
    %c0_72 = arith.constant 0 : index
    %88 = vector.load %arg5[%c2_70, %c0_71, %c0_72] : memref<4x1x8xf32, #tpu.memory_space<vmem>>, vector<1x1x8xf32>
    %89 = vector.shape_cast %88 : vector<1x1x8xf32> to vector<1x8xf32>
    %90 = vector.broadcast %89 : vector<1x8xf32> to vector<8x8xf32>
    %91 = arith.addf %87, %90 : vector<8x8xf32>
    %cst_73 = arith.constant 0.353553385 : f32
    %92 = vector.broadcast %cst_73 : f32 to vector<8x8xf32>
    %93 = arith.mulf %91, %92 : vector<8x8xf32>
    %c2_74 = arith.constant 2 : index
    %c0_75 = arith.constant 0 : index
    %c0_76 = arith.constant 0 : index
    %94 = vector.load %arg6[%c2_74, %c0_75, %c0_76] : memref<4x32x8xf32, #tpu.memory_space<vmem>>, vector<1x32x8xf32>
    %95 = vector.shape_cast %94 : vector<1x32x8xf32> to vector<32x8xf32>
    %cst_77 = arith.constant dense<0.000000e+00> : vector<8x8xf32>
    %96 = tpu.matmul %3, %95, %cst_77 {dimension_numbers = #tpu.dot_dimension_numbers<[1], [0], [0], [1], [0, 0, 1, 1], [], []>} : vector<8x32xf32>, vector<32x8xf32>, vector<8x8xf32> -> vector<8x8xf32>
    %c2_78 = arith.constant 2 : index
    %c0_79 = arith.constant 0 : index
    %c0_80 = arith.constant 0 : index
    %97 = vector.load %arg7[%c2_78, %c0_79, %c0_80] : memref<4x1x8xf32, #tpu.memory_space<vmem>>, vector<1x1x8xf32>
    %98 = vector.shape_cast %97 : vector<1x1x8xf32> to vector<1x8xf32>
    %99 = vector.broadcast %98 : vector<1x8xf32> to vector<8x8xf32>
    %100 = arith.addf %96, %99 : vector<8x8xf32>
    %c2_81 = arith.constant 2 : index
    %c0_82 = arith.constant 0 : index
    %c0_83 = arith.constant 0 : index
    %101 = vector.load %arg8[%c2_81, %c0_82, %c0_83] : memref<4x32x8xf32, #tpu.memory_space<vmem>>, vector<1x32x8xf32>
    %102 = vector.shape_cast %101 : vector<1x32x8xf32> to vector<32x8xf32>
    %cst_84 = arith.constant dense<0.000000e+00> : vector<8x8xf32>
    %103 = tpu.matmul %5, %102, %cst_84 {dimension_numbers = #tpu.dot_dimension_numbers<[1], [0], [0], [1], [0, 0, 1, 1], [], []>} : vector<8x32xf32>, vector<32x8xf32>, vector<8x8xf32> -> vector<8x8xf32>
    %c2_85 = arith.constant 2 : index
    %c0_86 = arith.constant 0 : index
    %c0_87 = arith.constant 0 : index
    %104 = vector.load %arg9[%c2_85, %c0_86, %c0_87] : memref<4x1x8xf32, #tpu.memory_space<vmem>>, vector<1x1x8xf32>
    %105 = vector.shape_cast %104 : vector<1x1x8xf32> to vector<1x8xf32>
    %106 = vector.broadcast %105 : vector<1x8xf32> to vector<8x8xf32>
    %107 = arith.addf %103, %106 : vector<8x8xf32>
    %cst_88 = arith.constant dense<0.000000e+00> : vector<8x8xf32>
    %108 = tpu.matmul %93, %100, %cst_88 {dimension_numbers = #tpu.dot_dimension_numbers<[1], [1], [0], [0], [0, 0, 1, 0], [], []>} : vector<8x8xf32>, vector<8x8xf32>, vector<8x8xf32> -> vector<8x8xf32>
    %cst_89 = arith.constant dense<0xFF800000> : vector<8xf32>
    %109 = vector.multi_reduction <maximumf>, %108, %cst_89 [1] : vector<8x8xf32> to vector<8xf32>
    %110 = vector.shape_cast %109 : vector<8xf32> to vector<8x1xf32>
    %111 = vector.broadcast %110 : vector<8x1xf32> to vector<8x8xf32>
    %112 = arith.subf %108, %111 : vector<8x8xf32>
    %113 = math.exp %112 : vector<8x8xf32>
    %cst_90 = arith.constant dense<0.000000e+00> : vector<8xf32>
    %114 = vector.multi_reduction <add>, %113, %cst_90 [1] : vector<8x8xf32> to vector<8xf32>
    %115 = vector.shape_cast %114 : vector<8xf32> to vector<8x1xf32>
    %116 = tpu.reciprocal %115 {approx = true} : vector<8x1xf32> -> vector<8x1xf32>
    %117 = vector.broadcast %116 : vector<8x1xf32> to vector<8x8xf32>
    %118 = arith.mulf %113, %117 : vector<8x8xf32>
    %cst_91 = arith.constant dense<0.000000e+00> : vector<8x8xf32>
    %119 = tpu.matmul %118, %107, %cst_91 {dimension_numbers = #tpu.dot_dimension_numbers<[1], [0], [0], [1], [0, 0, 1, 1], [], []>} : vector<8x8xf32>, vector<8x8xf32>, vector<8x8xf32> -> vector<8x8xf32>
    %c2_92 = arith.constant 2 : index
    %c0_93 = arith.constant 0 : index
    %c0_94 = arith.constant 0 : index
    %120 = vector.load %arg10[%c2_92, %c0_93, %c0_94] : memref<4x8x32xf32, #tpu.memory_space<vmem>>, vector<1x8x32xf32>
    %121 = vector.shape_cast %120 : vector<1x8x32xf32> to vector<8x32xf32>
    %cst_95 = arith.constant dense<0.000000e+00> : vector<8x32xf32>
    %122 = tpu.matmul %119, %121, %cst_95 {dimension_numbers = #tpu.dot_dimension_numbers<[1], [0], [0], [1], [0, 0, 1, 1], [], []>} : vector<8x8xf32>, vector<8x32xf32>, vector<8x32xf32> -> vector<8x32xf32>
    %123 = arith.addf %84, %122 : vector<8x32xf32>
    %c3 = arith.constant 3 : index
    %c0_96 = arith.constant 0 : index
    %c0_97 = arith.constant 0 : index
    %124 = vector.load %arg4[%c3, %c0_96, %c0_97] : memref<4x32x8xf32, #tpu.memory_space<vmem>>, vector<1x32x8xf32>
    %125 = vector.shape_cast %124 : vector<1x32x8xf32> to vector<32x8xf32>
    %cst_98 = arith.constant dense<0.000000e+00> : vector<8x8xf32>
    %126 = tpu.matmul %1, %125, %cst_98 {dimension_numbers = #tpu.dot_dimension_numbers<[1], [0], [0], [1], [0, 0, 1, 1], [], []>} : vector<8x32xf32>, vector<32x8xf32>, vector<8x8xf32> -> vector<8x8xf32>
    %c3_99 = arith.constant 3 : index
    %c0_100 = arith.constant 0 : index
    %c0_101 = arith.constant 0 : index
    %127 = vector.load %arg5[%c3_99, %c0_100, %c0_101] : memref<4x1x8xf32, #tpu.memory_space<vmem>>, vector<1x1x8xf32>
    %128 = vector.shape_cast %127 : vector<1x1x8xf32> to vector<1x8xf32>
    %129 = vector.broadcast %128 : vector<1x8xf32> to vector<8x8xf32>
    %130 = arith.addf %126, %129 : vector<8x8xf32>
    %cst_102 = arith.constant 0.353553385 : f32
    %131 = vector.broadcast %cst_102 : f32 to vector<8x8xf32>
    %132 = arith.mulf %130, %131 : vector<8x8xf32>
    %c3_103 = arith.constant 3 : index
    %c0_104 = arith.constant 0 : index
    %c0_105 = arith.constant 0 : index
    %133 = vector.load %arg6[%c3_103, %c0_104, %c0_105] : memref<4x32x8xf32, #tpu.memory_space<vmem>>, vector<1x32x8xf32>
    %134 = vector.shape_cast %133 : vector<1x32x8xf32> to vector<32x8xf32>
    %cst_106 = arith.constant dense<0.000000e+00> : vector<8x8xf32>
    %135 = tpu.matmul %3, %134, %cst_106 {dimension_numbers = #tpu.dot_dimension_numbers<[1], [0], [0], [1], [0, 0, 1, 1], [], []>} : vector<8x32xf32>, vector<32x8xf32>, vector<8x8xf32> -> vector<8x8xf32>
    %c3_107 = arith.constant 3 : index
    %c0_108 = arith.constant 0 : index
    %c0_109 = arith.constant 0 : index
    %136 = vector.load %arg7[%c3_107, %c0_108, %c0_109] : memref<4x1x8xf32, #tpu.memory_space<vmem>>, vector<1x1x8xf32>
    %137 = vector.shape_cast %136 : vector<1x1x8xf32> to vector<1x8xf32>
    %138 = vector.broadcast %137 : vector<1x8xf32> to vector<8x8xf32>
    %139 = arith.addf %135, %138 : vector<8x8xf32>
    %c3_110 = arith.constant 3 : index
    %c0_111 = arith.constant 0 : index
    %c0_112 = arith.constant 0 : index
    %140 = vector.load %arg8[%c3_110, %c0_111, %c0_112] : memref<4x32x8xf32, #tpu.memory_space<vmem>>, vector<1x32x8xf32>
    %141 = vector.shape_cast %140 : vector<1x32x8xf32> to vector<32x8xf32>
    %cst_113 = arith.constant dense<0.000000e+00> : vector<8x8xf32>
    %142 = tpu.matmul %5, %141, %cst_113 {dimension_numbers = #tpu.dot_dimension_numbers<[1], [0], [0], [1], [0, 0, 1, 1], [], []>} : vector<8x32xf32>, vector<32x8xf32>, vector<8x8xf32> -> vector<8x8xf32>
    %c3_114 = arith.constant 3 : index
    %c0_115 = arith.constant 0 : index
    %c0_116 = arith.constant 0 : index
    %143 = vector.load %arg9[%c3_114, %c0_115, %c0_116] : memref<4x1x8xf32, #tpu.memory_space<vmem>>, vector<1x1x8xf32>
    %144 = vector.shape_cast %143 : vector<1x1x8xf32> to vector<1x8xf32>
    %145 = vector.broadcast %144 : vector<1x8xf32> to vector<8x8xf32>
    %146 = arith.addf %142, %145 : vector<8x8xf32>
    %cst_117 = arith.constant dense<0.000000e+00> : vector<8x8xf32>
    %147 = tpu.matmul %132, %139, %cst_117 {dimension_numbers = #tpu.dot_dimension_numbers<[1], [1], [0], [0], [0, 0, 1, 0], [], []>} : vector<8x8xf32>, vector<8x8xf32>, vector<8x8xf32> -> vector<8x8xf32>
    %cst_118 = arith.constant dense<0xFF800000> : vector<8xf32>
    %148 = vector.multi_reduction <maximumf>, %147, %cst_118 [1] : vector<8x8xf32> to vector<8xf32>
    %149 = vector.shape_cast %148 : vector<8xf32> to vector<8x1xf32>
    %150 = vector.broadcast %149 : vector<8x1xf32> to vector<8x8xf32>
    %151 = arith.subf %147, %150 : vector<8x8xf32>
    %152 = math.exp %151 : vector<8x8xf32>
    %cst_119 = arith.constant dense<0.000000e+00> : vector<8xf32>
    %153 = vector.multi_reduction <add>, %152, %cst_119 [1] : vector<8x8xf32> to vector<8xf32>
    %154 = vector.shape_cast %153 : vector<8xf32> to vector<8x1xf32>
    %155 = tpu.reciprocal %154 {approx = true} : vector<8x1xf32> -> vector<8x1xf32>
    %156 = vector.broadcast %155 : vector<8x1xf32> to vector<8x8xf32>
    %157 = arith.mulf %152, %156 : vector<8x8xf32>
    %cst_120 = arith.constant dense<0.000000e+00> : vector<8x8xf32>
    %158 = tpu.matmul %157, %146, %cst_120 {dimension_numbers = #tpu.dot_dimension_numbers<[1], [0], [0], [1], [0, 0, 1, 1], [], []>} : vector<8x8xf32>, vector<8x8xf32>, vector<8x8xf32> -> vector<8x8xf32>
    %c3_121 = arith.constant 3 : index
    %c0_122 = arith.constant 0 : index
    %c0_123 = arith.constant 0 : index
    %159 = vector.load %arg10[%c3_121, %c0_122, %c0_123] : memref<4x8x32xf32, #tpu.memory_space<vmem>>, vector<1x8x32xf32>
    %160 = vector.shape_cast %159 : vector<1x8x32xf32> to vector<8x32xf32>
    %cst_124 = arith.constant dense<0.000000e+00> : vector<8x32xf32>
    %161 = tpu.matmul %158, %160, %cst_124 {dimension_numbers = #tpu.dot_dimension_numbers<[1], [0], [0], [1], [0, 0, 1, 1], [], []>} : vector<8x8xf32>, vector<8x32xf32>, vector<8x32xf32> -> vector<8x32xf32>
    %162 = arith.addf %123, %161 : vector<8x32xf32>
    %c0_125 = arith.constant 0 : index
    %c0_126 = arith.constant 0 : index
    %163 = vector.load %arg11[%c0_125, %c0_126] : memref<1x32xf32, #tpu.memory_space<vmem>>, vector<1x32xf32>
    %164 = vector.broadcast %163 : vector<1x32xf32> to vector<8x32xf32>
    %165 = arith.addf %162, %164 : vector<8x32xf32>
    %c0_127 = arith.constant 0 : index
    %c0_128 = arith.constant 0 : index
    %c0_129 = arith.constant 0 : index
    %166 = vector.load %arg12[%c0_127, %c0_128, %c0_129] : memref<1x8x32xf32, #tpu.memory_space<vmem>>, vector<1x8x32xf32>
    %167 = vector.shape_cast %166 : vector<1x8x32xf32> to vector<8x32xf32>
    %168 = vector.shape_cast %165 : vector<8x32xf32> to vector<1x8x32xf32>
    tpu.vector_store %arg12[%c0_127, %c0_128, %c0_129], %168 {strides = array<i32>} : memref<1x8x32xf32, #tpu.memory_space<vmem>>, vector<1x8x32xf32>,
    return
  }
  func.func @transform_0(%arg0: i32) -> (i32, i32, i32) {
    %c0_i32 = arith.constant 0 : i32
    %c0_i32_0 = arith.constant 0 : i32
    %c0_i32_1 = arith.constant 0 : i32
    return %arg0, %c0_i32, %c0_i32_0 : i32, i32, i32
  }
  func.func @transform_1(%arg0: i32) -> (i32, i32, i32) {
    %c0_i32 = arith.constant 0 : i32
    %c0_i32_0 = arith.constant 0 : i32
    %c0_i32_1 = arith.constant 0 : i32
    return %arg0, %c0_i32, %c0_i32_0 : i32, i32, i32
  }
  func.func @transform_2(%arg0: i32) -> (i32, i32, i32) {
    %c0_i32 = arith.constant 0 : i32
    %c0_i32_0 = arith.constant 0 : i32
    %c0_i32_1 = arith.constant 0 : i32
    return %arg0, %c0_i32, %c0_i32_0 : i32, i32, i32
  }
  func.func @transform_3(%arg0: i32) -> (i32, i32, i32) {
    %c0_i32 = arith.constant 0 : i32
    %c0_i32_0 = arith.constant 0 : i32
    %c0_i32_1 = arith.constant 0 : i32
    %c0_i32_2 = arith.constant 0 : i32
    return %c0_i32, %c0_i32_0, %c0_i32_1 : i32, i32, i32
  }
  func.func @transform_4(%arg0: i32) -> (i32, i32, i32) {
    %c0_i32 = arith.constant 0 : i32
    %c0_i32_0 = arith.constant 0 : i32
    %c0_i32_1 = arith.constant 0 : i32
    %c0_i32_2 = arith.constant 0 : i32
    return %c0_i32, %c0_i32_0, %c0_i32_1 : i32, i32, i32
  }
  func.func @transform_5(%arg0: i32) -> (i32, i32, i32) {
    %c0_i32 = arith.constant 0 : i32
    %c0_i32_0 = arith.constant 0 : i32
    %c0_i32_1 = arith.constant 0 : i32
    %c0_i32_2 = arith.constant 0 : i32
    return %c0_i32, %c0_i32_0, %c0_i32_1 : i32, i32, i32
  }
  func.func @transform_6(%arg0: i32) -> (i32, i32, i32) {
    %c0_i32 = arith.constant 0 : i32
    %c0_i32_0 = arith.constant 0 : i32
    %c0_i32_1 = arith.constant 0 : i32
    %c0_i32_2 = arith.constant 0 : i32
    return %c0_i32, %c0_i32_0, %c0_i32_1 : i32, i32, i32
  }
  func.func @transform_7(%arg0: i32) -> (i32, i32, i32) {
    %c0_i32 = arith.constant 0 : i32
    %c0_i32_0 = arith.constant 0 : i32
    %c0_i32_1 = arith.constant 0 : i32
    %c0_i32_2 = arith.constant 0 : i32
    return %c0_i32, %c0_i32_0, %c0_i32_1 : i32, i32, i32
  }
  func.func @transform_8(%arg0: i32) -> (i32, i32, i32) {
    %c0_i32 = arith.constant 0 : i32
    %c0_i32_0 = arith.constant 0 : i32
    %c0_i32_1 = arith.constant 0 : i32
    %c0_i32_2 = arith.constant 0 : i32
    return %c0_i32, %c0_i32_0, %c0_i32_1 : i32, i32, i32
  }
  func.func @transform_9(%arg0: i32) -> (i32, i32, i32) {
    %c0_i32 = arith.constant 0 : i32
    %c0_i32_0 = arith.constant 0 : i32
    %c0_i32_1 = arith.constant 0 : i32
    %c0_i32_2 = arith.constant 0 : i32
    return %c0_i32, %c0_i32_0, %c0_i32_1 : i32, i32, i32
  }
  func.func @transform_10(%arg0: i32) -> (i32, i32) {
    %c0_i32 = arith.constant 0 : i32
    %c0_i32_0 = arith.constant 0 : i32
    %c0_i32_1 = arith.constant 0 : i32
    return %c0_i32, %c0_i32_0 : i32, i32
  }
  func.func @transform_11(%arg0: i32) -> (i32, i32, i32) {
    %c0_i32 = arith.constant 0 : i32
    %c0_i32_0 = arith.constant 0 : i32
    %c0_i32_1 = arith.constant 0 : i32
    return %arg0, %c0_i32, %c0_i32_0 : i32, i32, i32
  }
}

</mosaic_0001>

<bundles_post_ra>
// kernel: tpu_custom_call.1
= control target key start
LH: loop header
LB: loop body
LE: loop exit
PB: predicated region body
PF: predicated region fallthrough
CT: control target
= control target key end

     0   :  { %s1863_s0 = inlined_call_operand.vmem [shape: f32[2,8,32], index: 0, kind: input, shape index: {}]   ;;  %s1864_s1 = inlined_call_operand.vmem [shape: f32[2,8,32], index: 1, kind: input, shape index: {}]   ;;  %s1865_s2 = inlined_call_operand.vmem [shape: f32[2,8,32], index: 2, kind: input, shape index: {}]   ;;  %s1866_s3 = inlined_call_operand.vmem [shape: f32[4,32,8], index: 3, kind: input, shape index: {}]   ;;  %s1867_s4 = inlined_call_operand.vmem [shape: f32[4,1,8], index: 4, kind: input, shape index: {}]   ;;  %s1868_s5 = inlined_call_operand.vmem [shape: f32[4,32,8], index: 5, kind: input, shape index: {}]   ;;  %s1869_s6 = inlined_call_operand.vmem [shape: f32[4,1,8], index: 6, kind: input, shape index: {}]   ;;  %s1870_s7 = inlined_call_operand.vmem [shape: f32[4,32,8], index: 7, kind: input, shape index: {}]   ;;  %s1871_s8 = inlined_call_operand.vmem [shape: f32[4,1,8], index: 8, kind: input, shape index: {}]   ;;  %s1872_s9 = inlined_call_operand.vmem [shape: f32[4,8,32], index: 9, kind: input, shape index: {}]   ;;  %s1873_s10 = inlined_call_operand.vmem [shape: f32[1,32], index: 10, kind: input, shape index: {}]   ;;  %s1874_s11 = inlined_call_operand.hbm [shape: f32[2,8,32], index: 11, kind: output, shape index: {}]  }
   0x1   :  { %1875 = sst [smem:[#allocation6_spill]] %s1863_s0 }
   0x2   :  { %16 = vsyncpa [#allocation3], 0 }
   0x3   :  { %18 = vsyncpa [#allocation3 + $0x1], 0  ;;  %s1514_s17 = smov 0   ;;  %s1516_s18 = smov 0  }
   0x4   :  { %s1518_s19 = smov 0   ;;  %s1520_s20 = smov 0  }
   0x5 LB: > { %s1535_s21 = sadd.s32 4294967295, %s1452_s20   ;;  %s1234_s22 = sadd.s32 4294967294, %s1452_s20   ;;  %s1452_s20 = sphi %s1520_s20, %s1884_s20   ;;  %s1448_s19 = sphi %s1518_s19, %s1883_s19   ;;  %s1444_s18 = sphi %s1516_s18, %s1882_s18   ;;  %s1440_s17 = sphi %s1514_s17, %s1881_s17  }
   0x6   : > { %s1539_s23 = sadd.s32 1, %s1452_s20   ;;  %s277_s24 = sadd.s32 1, %s1448_s19 }
   0x7   : > { %s274_s25 = ssub.s32 %s1452_s20, %s1539_s23  ;;  %p287_p0 = scmp.ne.s32.totalorder %s1448_s19, %s1444_s18 }
   0x8   : > { %p275_p1 = scmp.eq.s32.totalorder %s274_s25, 0  ;;  %p288_p2 = scmp.eq.s32.totalorder %s1535_s21, 1 }
   0x9   : > { %p293_p3 = scmp.ne.s32.totalorder %s1444_s18, %s1440_s17  ;;  %p294_p4 = scmp.eq.s32.totalorder %s1234_s22, 1 }
   0xa   : > { %s1550_s26 = scalar_select %p275_p1, %s1448_s19, %s277_s24  }
   0xb   : > { %p1552_p5 = por %p288_p2, %p287_p0  ;;  %p1556_p6 = por %p294_p4, %p293_p3 }
   0xc   : > { %1876 = sst [smem:[#allocation5_spill]] %s1550_s26  ;;  %p1237_p7 = scmp.ge.s32.totalorder %s1452_s20, 1 }
   0xd   : > { %p357_p8 = scmp.lt.s32.totalorder %s1452_s20, 3 }
   0xf   : > { %p358_p9 = pnand %p1237_p7, %p357_p8 }
  0x10   : > { %p404_p10 = scmp.lt.s32.totalorder (!%p358_p9), %s1535_s21, 1  ;;  %s1879_s0 = sld [smem:[#allocation6_spill]] (!%p358_p9) }
  0x11   : > { %361 = sbr.rel (%p358_p9) target bundleno = 2251 (0x8cb), region = 64  ;;  %s1319_s30 = sshll.u32 (!%p358_p9), %s1535_s21, 3 }
  0x16   : > { %v455_v0 = vld [vmem:[%s1868_s5 + $0x18] sm:$0xff]  ;;  %v454_v2 = vld [vmem:[%s1868_s5 + $0x10] sm:$0xff]  ;;  %v453_v4 = vld [vmem:[%s1868_s5 + $0x8] sm:$0xff]  ;;  %s405_s12 = scalar_select %p404_p10, %s1535_s21, 1  ;;  %vm427_vm0 = vcmask 261120   ;;  %vm514_vm1 = vcmask 64512  }
  0x17   : > { %v422_v1 = vld [vmem:[%s1866_s3 + $0x18] sm:$0xff]  ;;  %475 = vmatpush.msra.mxu1 %v455_v0  ;;  %v421_v3 = vld [vmem:[%s1866_s3 + $0x10] sm:$0xff]  ;;  %v420_v5 = vld [vmem:[%s1866_s3 + $0x8] sm:$0xff] }
  0x18   : > { %443 = vmatpush.msra.mxu0 %v422_v1  ;;  %v452_v6 = vld [vmem:[%s1868_s5] sm:$0xff]  ;;  %s1588_s16 = sshll.u32 %s405_s12, 3  ;;  %v486_v17 = vld [vmem:[%s1870_s7 + $0x18] sm:$0xff]  ;;  %v485_v18 = vld [vmem:[%s1870_s7 + $0x10] sm:$0xff] }
  0x19   : > { %476 = vmatpush.msra.mxu1 %v454_v2  ;;  %v419_v7 = vld [vmem:[%s1866_s3] sm:$0xff]  ;;  %s411_s25 = scalar_lea.vmem %s1864_s1, %s1588_s16  ;;  %s407_s13 = scalar_lea.vmem %s1879_s0, %s1588_s16  ;;  %506 = vmatpush.msra.mxu2 %v486_v17  ;;  %v484_v19 = vld [vmem:[%s1870_s7 + $0x8] sm:$0xff]  ;;  %v1257_v24 = vld [vmem:[%s1868_s5 + $0x38] sm:$0xff] }
  0x1a   : > { %444 = vmatpush.msra.mxu0 %v421_v3  ;;  %v1598_v8 = vld [vmem:[%s411_s25] sm:$0xff]  ;;  %s415_s22 = scalar_lea.vmem %s1865_s2, %s1588_s16  ;;  %v1251_v25 = vld [vmem:[%s1866_s3 + $0x38] sm:$0xff]  ;;  %v1256_v26 = vld [vmem:[%s1868_s5 + $0x30] sm:$0xff]  ;;  %s401_s25 = sand.u32 1, %s1444_s18  }
  0x1b   : > { %477 = vmatpush.msra.mxu1 %v453_v4  ;;  %v1600_v9 = vld [vmem:[%s407_s13] sm:$0xff]  ;;  %507 = vmatpush.msra.mxu2 %v485_v18  ;;  %v1250_v27 = vld [vmem:[%s1866_s3 + $0x30] sm:$0xff]  ;;  %v1255_v28 = vld [vmem:[%s1868_s5 + $0x28] sm:$0xff]  ;;  %s1238_s29 = sshll.u32 %s401_s25, 3  ;;  %s1146_s16 = scalar_lea.hbm %s1874_s11, %s1319_s30 }
  0x1c   : > { %445 = vmatpush.msra.mxu0 %v420_v5  ;;  %v1361_v10 = vld [vmem:[%s1869_s6] ss:$0 sm:$0xff]  ;;  %v1249_v29 = vld [vmem:[%s1866_s3 + $0x28] sm:$0xff]  ;;  %v1364_v40 = vld [vmem:[%s1869_s6 + $0x1] ss:$0 sm:$0xff]  ;;  %s403_s15 = scalar_lea.vmem [#allocation2], %s1238_s29 }
  0x1d   : > { %478 = vmatpush.msra.mxu1 %v452_v6  ;;  %v1362_v11 = vld [vmem:[%s1867_s4] ss:$0 sm:$0xff]  ;;  %508 = vmatpush.msra.mxu2 %v484_v19  ;;  %v1263_v43 = vld [vmem:[%s1870_s7 + $0x38] sm:$0xff]  ;;  %v1262_v44 = vld [vmem:[%s1870_s7 + $0x30] sm:$0xff]  ;;  %s1150_s24 = sshll.u32 %s1146_s16, 4  ;;  %s1136_s21 = scalar_lea.sflag [#allocation3], %s401_s25  ;;  %s1151_s24 = int_to_ptr.hbm [resolvable:$true] %s1150_s24 }
  0x1e   : > { %446 = vmatpush.msra.mxu0 %v419_v7  ;;  %1243 = vmatmul.msk.f32.vlgmr.msra.gmra.mxu1 %vm427_vm0, %v1598_v8  ;;  %v483_v20 = vld [vmem:[%s1870_s7] sm:$0xff]  ;;  %v1261_v45 = vld [vmem:[%s1870_s7 + $0x28] sm:$0xff]  ;;  %v1275_v2 = vld [vmem:[%s1866_s3 + $0x58] sm:$0xff]  ;;  %s1404_s0 = sshra.s32 %s1151_s24, 4  ;;  %s1410_s29 = scalar_lea.hbm %s1874_s11, 16  ;;  %s1405_s0 = int_to_ptr.hbm [resolvable:$true] %s1404_s0 }
  0x1f   : > { %1242 = vmatmul.msk.f32.vlgmr.msra.gmra.mxu0 %vm427_vm0, %v1600_v9  ;;  %509 = vmatpush.msra.mxu2 %v483_v20  ;;  %v1631_v23 = vld [vmem:[%s415_s22] sm:$0xff]  ;;  %v1274_v3 = vld [vmem:[%s1866_s3 + $0x50] sm:$0xff]  ;;  %v1273_v4 = vld [vmem:[%s1866_s3 + $0x48] sm:$0xff]  ;;  %s1148_s22 = sshll.u32 %s403_s15, 4  ;;  %s1406_s13 = scalar_lea.hbm %s1405_s0, 8  ;;  %s1149_s22 = int_to_ptr.vmem [resolvable:$true] %s1148_s22 }
  0x20   : > { %1244 = vmatmul.msk.f32.vlgmr.msra.gmra.mxu2 %vm427_vm0, %v1631_v23  ;;  %629 = vmatpush.msrb.mxu1 %v1257_v24  ;;  %v1254_v30 = vld [vmem:[%s1868_s5 + $0x20] sm:$0xff]  ;;  %v1281_v5 = vld [vmem:[%s1868_s5 + $0x58] sm:$0xff]  ;;  %v1280_v7 = vld [vmem:[%s1868_s5 + $0x50] sm:$0xff]  ;;  %p1407_p11 = scmp.ne.s32.totalorder %s1405_s0, %s1406_s13  ;;  %p1411_p0 = scmp.lt.s32.totalorder %s1405_s0, %s1874_s11 }
  0x21   : > { %598 = vmatpush.msrb.mxu0 %v1251_v25  ;;  %v1248_v31 = vld [vmem:[%s1866_s3 + $0x20] sm:$0xff]  ;;  %659 = vmatpush.msrb.mxu2 %v1263_v43  ;;  %v1287_v25 = vld [vmem:[%s1870_s7 + $0x58] sm:$0xff]  ;;  %v1302_v43 = vld [vmem:[%s1868_s5 + $0x68] sm:$0xff]  ;;  %p1412_p1 = scmp.lt.s32.totalorder %s1410_s29, %s1406_s13 }
  0x22   : > { %630 = vmatpush.msrb.mxu1 %v1256_v26  ;;  %v1363_v37 = vld [vmem:[%s1871_s8] ss:$0 sm:$0xff]  ;;  %v1365_v48 = vld [vmem:[%s1867_s4 + $0x1] ss:$0 sm:$0xff]  ;;  %v1368_v17 = vld [vmem:[%s1867_s4 + $0x2] ss:$0 sm:$0xff]  ;;  %p1408_p12 = pnand %p1407_p11, %p1552_p5 }
  0x23   : > { %599 = vmatpush.msrb.mxu0 %v1250_v27  ;;  %660 = vmatpush.msrb.mxu2 %v1262_v44  ;;  %v1260_v46 = vld [vmem:[%s1870_s7 + $0x20] sm:$0xff]  ;;  %p1413_p2 = por %p1412_p1, %p1411_p0 }
  0x24   : > { %631 = vmatpush.msrb.mxu1 %v1255_v28  ;;  %v575_v54 = vld [vmem:[%s1872_s9] sm:$0xff]  ;;  %p1409_p13 = pneg %p1408_p12 }
  0x25   : > { %600 = vmatpush.msrb.mxu0 %v1249_v29  ;;  %661 = vmatpush.msrb.mxu2 %v1261_v45  ;;  %v1366_v55 = vld [vmem:[%s1871_s8 + $0x1] ss:$0 sm:$0xff]  ;;  %v1367_v19 = vld [vmem:[%s1869_s6 + $0x2] ss:$0 sm:$0xff]  ;;  %v1286_v29 = vld [vmem:[%s1870_s7 + $0x50] sm:$0xff] }
  0x26   : > { %632 = vmatpush.msrb.mxu1 %v1254_v30  ;;  %v1272_v6 = vld [vmem:[%s1866_s3 + $0x40] sm:$0xff]  ;;  %v1285_v30 = vld [vmem:[%s1870_s7 + $0x48] sm:$0xff]  ;;  %v1298_v45 = vld [vmem:[%s1866_s3 + $0x78] sm:$0xff]  ;;  %p1414_p3 = pnand %p1413_p2, %p1409_p13 }
  0x27   : > { %601 = vmatpush.msrb.mxu0 %v1248_v31  ;;  %1259 = vmatmul.msk.f32.vlgmr.msrb.gmra.mxu1 %vm427_vm0, %v1598_v8  ;;  %v1284_v31 = vld [vmem:[%s1870_s7 + $0x40] sm:$0xff] }
  0x28   : > { %1253 = vmatmul.msk.f32.vlgmr.msrb.gmra.mxu0 %vm427_vm0, %v1600_v9  ;;  %662 = vmatpush.msrb.mxu2 %v1260_v46  ;;  %v1301_v44 = vld [vmem:[%s1868_s5 + $0x60] sm:$0xff]  ;;  %v1297_v46 = vld [vmem:[%s1866_s3 + $0x70] sm:$0xff] }
  0x29   : > { %1265 = vmatmul.msk.f32.vlgmr.msrb.gmra.mxu2 %vm427_vm0, %v1631_v23 }
  0x2a   : > { %770 = vmatpush.msra.mxu2 %v575_v54 }
  0x9b   : > { %v480_v12 = vpop.f32.mrf.mxu1 }
  0x9c   : > { %v448_v13 = vpop.f32.mrf.mxu0  ;;  %v481_v14 = vadd.f32 %v1361_v10, %v480_v12  ;;  %v1279_v10 = vld [vmem:[%s1868_s5 + $0x48] sm:$0xff] }
  0x9d   : > { %v449_v15 = vadd.f32 %v1362_v11, %v448_v13  ;;  %v1278_v11 = vld [vmem:[%s1868_s5 + $0x40] sm:$0xff] }
  0x9e   : > { %1245 = vmatpush.xpose.msk.msra.mxu3 %vm514_vm1, %v481_v14 }
  0x9f   : > { %v451_v16 = vmul.f32 0.35355338, %v449_v15  ;;  %v1269_v15 = vld [vmem:[%s1872_s9 + $0x8] sm:$0xff] }
  0xa0   : > { %747 = vmatpush.msra.mxu1 %v1269_v15 }
  0xa1   : > { %1246 = vmatmul.msk.f32.vlgmr.msra.gmra.mxu3 %vm514_vm1, %v451_v16 }
  0xa2   : > { %858 = vmatpush.msrb.mxu1 %v1287_v25 }
  0xa3   : > { %v511_v38 = vpop.f32.mrf.mxu2 }
  0xa4   : > { %v512_v39 = vadd.f32 %v1363_v37, %v511_v38  ;;  %v634_v41 = vpop.f32.mrf.mxu1  ;;  %859 = vmatpush.msrb.mxu1 %v1286_v29  ;;  %v1369_v38 = vld [vmem:[%s1871_s8 + $0x2] ss:$0 sm:$0xff] }
  0xa5   : > { %v635_v42 = vadd.f32 %v1364_v40, %v634_v41  ;;  %v603_v50 = vpop.f32.mrf.mxu0 }
  0xa6   : > { %570 = vmatpush.msrb.mxu3 %v512_v39  ;;  %v604_v52 = vadd.f32 %v1365_v48, %v603_v50  ;;  %860 = vmatpush.msrb.mxu1 %v1285_v30  ;;  %v1304_v39 = vld [vmem:[%s1868_s5 + $0x78] sm:$0xff]  ;;  %v1296_v48 = vld [vmem:[%s1866_s3 + $0x68] sm:$0xff] }
  0xa8   : > { %1266 = vmatpush.xpose.msk.msra.mxu3 %vm514_vm1, %v635_v42  ;;  %v606_v53 = vmul.f32 0.35355338, %v604_v52  ;;  %861 = vmatpush.msrb.mxu1 %v1284_v31  ;;  %v1303_v42 = vld [vmem:[%s1868_s5 + $0x70] sm:$0xff] }
  0xac   : > { %v664_v56 = vpop.f32.mrf.mxu2 }
  0xad   : > { %v665_v57 = vadd.f32 %v1366_v55, %v664_v56  ;;  %v1371_v55 = vld [vmem:[%s1867_s4 + $0x3] ss:$0 sm:$0xff] }
  0xaf   : > { %722 = vmatpush.msra.mxu0 %v665_v57 }
  0xb1   : > { %828 = vmatpush.msrb.mxu0 %v1281_v5 }
  0xb3   : > { %829 = vmatpush.msrb.mxu0 %v1280_v7 }
  0xb5   : > { %830 = vmatpush.msrb.mxu0 %v1279_v10 }
  0xb7   : > { %831 = vmatpush.msrb.mxu0 %v1278_v11 }
 0x124   : > { %v538_v21 = vpop.f32.mrf.mxu3 }
 0x125   : > { %v541_v22 = vsel %vm514_vm1, %v538_v21, -inf }
 0x126   : > { %542 = vmax.xlane.f32.xlu0 %v541_v22 }
 0x199   : > { %v543_v32 = vpop.xlane.xlu0 %542 }
 0x19a   : > { %v544_v33 = vsub.f32 %v538_v21, %v543_v32 }
 0x19c   : > { %v545_v34 = vmul.f32 1.442695, %v544_v33 }
 0x19e   : > { %1374 = vpow2.f32 %v545_v34 }
 0x1a4   : > { %v1375_v35 = vpop.eup %1374 }
 0x1a5   : > { %v547_v36 = vsel %vm514_vm1, %v1375_v35, 0.0 }
 0x1a6   : > { %548 = vadd.xlane.f32.xlu0 %v547_v36 }
 0x219   : > { %v549_v47 = vpop.xlane.xlu0 %548 }
 0x21a   : > { %1376 = vrcp.f32 %v549_v47  ;;  %v1293_v47 = vld [vmem:[%s1872_s9 + $0x10] sm:$0xff] }
 0x220   : > { %v1377_v49 = vpop.eup %1376 }
 0x221   : > { %v551_v51 = vmul.f32 %v1377_v49, %v1375_v35  ;;  %v1295_v49 = vld [vmem:[%s1866_s3 + $0x60] sm:$0xff] }
 0x223   : > { %1247 = vmatmul.msk.f32.vlgmr.msrb.gmra.mxu3 %vm514_vm1, %v551_v51 }
 0x224   : > { %797 = vmatpush.msrb.mxu3 %v1275_v2 }
 0x226   : > { %798 = vmatpush.msrb.mxu3 %v1274_v3 }
 0x228   : > { %799 = vmatpush.msrb.mxu3 %v1273_v4 }
 0x22a   : > { %800 = vmatpush.msrb.mxu3 %v1272_v6 }
 0x22b   : > { %1267 = vmatmul.msk.f32.vlgmr.msra.gmra.mxu3 %vm514_vm1, %v606_v53 }
 0x233   : > { %1277 = vmatmul.msk.f32.vlgmr.msrb.gmra.mxu3 %vm427_vm0, %v1600_v9 }
 0x2a6   : > { %v572_v58 = vpop.f32.mrf.mxu3 }
 0x2a7   : > { %1271 = vmatmul.msk.f32.vlgmr.msra.gmra.mxu2 %vm514_vm1, %v572_v58 }
 0x2ae   : > { %v690_v59 = vpop.f32.mrf.mxu3 }
 0x2af   : > { %v693_v60 = vsel %vm514_vm1, %v690_v59, -inf }
 0x2b0   : > { %694 = vmax.xlane.f32.xlu1 %v693_v60  ;;  %v1309_v60 = vld [vmem:[%s1870_s7 + $0x70] sm:$0xff] }
 0x2b6   : > { %v802_v18 = vpop.f32.mrf.mxu3 }
 0x2b7   : > { %v803_v20 = vadd.f32 %v1368_v17, %v802_v18  ;;  %v1373_v18 = vld [vmem:[%s1873_s10] ss:$0 sm:$0xff] }
 0x2b9   : > { %v805_v24 = vmul.f32 0.35355338, %v803_v20 }
 0x323   : > { %v695_v61 = vpop.xlane.xlu1 %694 }
 0x324   : > { %v696_v62 = vsub.f32 %v690_v59, %v695_v61  ;;  %v1310_v59 = vld [vmem:[%s1870_s7 + $0x78] sm:$0xff]  ;;  %v1308_v61 = vld [vmem:[%s1870_s7 + $0x68] sm:$0xff] }
 0x326   : > { %v697_v63 = vmul.f32 1.442695, %v696_v62  ;;  %v1307_v62 = vld [vmem:[%s1870_s7 + $0x60] sm:$0xff] }
 0x328   : > { %1378 = vpow2.f32 %v697_v63 }
 0x32a   : > { %v1743_v26 = vpop.f32.mrf.mxu2 }
 0x32e   : > { %v1379_v0 = vpop.eup %1378 }
 0x32f   : > { %v699_v1 = vsel %vm514_vm1, %v1379_v0, 0.0 }
 0x330   : > { %700 = vadd.xlane.f32.xlu1 %v699_v1 }
 0x3a3   : > { %v701_v12 = vpop.xlane.xlu1 %700 }
 0x3a4   : > { %1380 = vrcp.f32 %v701_v12 }
 0x3aa   : > { %v1381_v13 = vpop.eup %1380 }
 0x3ab   : > { %v703_v14 = vmul.f32 %v1381_v13, %v1379_v0  ;;  %v1316_v13 = vld [vmem:[%s1872_s9 + $0x18] sm:$0xff] }
 0x3ad   : > { %1268 = vmatmul.msk.f32.vlgmr.msra.gmra.mxu0 %vm514_vm1, %v703_v14 }
 0x3ae   : > { %946 = vmatpush.msra.mxu0 %v1293_v47 }
 0x3b5   : > { %1283 = vmatmul.msk.f32.vlgmr.msrb.gmra.mxu0 %vm427_vm0, %v1598_v8 }
 0x42a   : > { %v724_v16 = vpop.f32.mrf.mxu0 }
 0x42b   : > { %1270 = vmatmul.msk.f32.vlgmr.msra.gmra.mxu1 %vm514_vm1, %v724_v16 }
 0x42c   : > { %974 = vmatpush.msra.mxu1 %v1298_v45 }
 0x42e   : > { %975 = vmatpush.msra.mxu1 %v1297_v46 }
 0x430   : > { %976 = vmatpush.msra.mxu1 %v1296_v48 }
 0x432   : > { %v833_v21 = vpop.f32.mrf.mxu0  ;;  %977 = vmatpush.msra.mxu1 %v1295_v49 }
 0x433   : > { %v834_v22 = vadd.f32 %v1367_v19, %v833_v21  ;;  %1289 = vmatmul.msk.f32.vlgmr.msrb.gmra.mxu1 %vm427_vm0, %v1631_v23 }
 0x435   : > { %1290 = vmatpush.xpose.msk.msrb.mxu2 %vm514_vm1, %v834_v22 }
 0x438   : > { %1291 = vmatmul.msk.f32.vlgmr.msrb.gmra.mxu2 %vm514_vm1, %v805_v24 }
 0x439   : > { %1005 = vmatpush.msra.mxu2 %v1304_v39 }
 0x43b   : > { %1006 = vmatpush.msra.mxu2 %v1303_v42  ;;  %1300 = vmatmul.msk.f32.vlgmr.msra.gmra.mxu1 %vm427_vm0, %v1600_v9 }
 0x43d   : > { %1007 = vmatpush.msra.mxu2 %v1302_v43 }
 0x43f   : > { %1008 = vmatpush.msra.mxu2 %v1301_v44 }
 0x440   : > { %1306 = vmatmul.msk.f32.vlgmr.msra.gmra.mxu2 %vm427_vm0, %v1598_v8  ;;  %v1370_v8 = vld [vmem:[%s1869_s6 + $0x3] ss:$0 sm:$0xff] }
 0x441   : > { %1123 = vmatpush.msrb.mxu2 %v1316_v13 }
 0x4a8   : > { %v749_v37 = vpop.f32.mrf.mxu1 }
 0x4a9   : > { %v773_v63 = vadd.f32 %v1743_v26, %v749_v37 }
 0x4b0   : > { %v863_v40 = vpop.f32.mrf.mxu1 }
 0x4b1   : > { %v864_v41 = vadd.f32 %v1369_v38, %v863_v40 }
 0x4b3   : > { %921 = vmatpush.msra.mxu3 %v864_v41 }
 0x4b5   : > { %1035 = vmatpush.msrb.mxu3 %v1310_v59 }
 0x4b7   : > { %1036 = vmatpush.msrb.mxu3 %v1309_v60 }
 0x4b8   : > { %v979_v56 = vpop.f32.mrf.mxu1 }
 0x4b9   : > { %v980_v57 = vadd.f32 %v1371_v55, %v979_v56  ;;  %1037 = vmatpush.msrb.mxu3 %v1308_v61 }
 0x4bb   : > { %v889_v27 = vpop.f32.mrf.mxu2  ;;  %v982_v58 = vmul.f32 0.35355338, %v980_v57  ;;  %1038 = vmatpush.msrb.mxu3 %v1307_v62 }
 0x4bc   : > { %v892_v28 = vsel %vm514_vm1, %v889_v27, -inf }
 0x4bd   : > { %893 = vmax.xlane.f32.xlu2 %v892_v28 }
 0x4c3   : > { %v1010_v53 = vpop.f32.mrf.mxu2 }
 0x4c4   : > { %v1011_v54 = vadd.f32 %v1370_v8, %v1010_v53 }
 0x4c6   : > { %1313 = vmatpush.xpose.msk.msrb.mxu0 %vm514_vm1, %v1011_v54 }
 0x530   : > { %v894_v32 = vpop.xlane.xlu2 %893 }
 0x531   : > { %v895_v33 = vsub.f32 %v889_v27, %v894_v32 }
 0x533   : > { %v896_v34 = vmul.f32 1.442695, %v895_v33 }
 0x535   : > { %1382 = vpow2.f32 %v896_v34 }
 0x53b   : > { %v1383_v35 = vpop.eup %1382 }
 0x53c   : > { %v898_v36 = vsel %vm514_vm1, %v1383_v35, 0.0 }
 0x53d   : > { %899 = vadd.xlane.f32.xlu2 %v898_v36 }
 0x5b0   : > { %v900_v50 = vpop.xlane.xlu2 %899 }
 0x5b1   : > { %1384 = vrcp.f32 %v900_v50 }
 0x5b7   : > { %v1385_v51 = vpop.eup %1384 }
 0x5b8   : > { %v902_v52 = vmul.f32 %v1385_v51, %v1383_v35 }
 0x5ba   : > { %1292 = vmatmul.msk.f32.vlgmr.msra.gmra.mxu3 %vm514_vm1, %v902_v52 }
 0x5c2   : > { %1312 = vmatmul.msk.f32.vlgmr.msrb.gmra.mxu3 %vm427_vm0, %v1631_v23  ;;  %v1372_v23 = vld [vmem:[%s1871_s8 + $0x3] ss:$0 sm:$0xff] }
 0x63d   : > { %v923_v9 = vpop.f32.mrf.mxu3 }
 0x63e   : > { %1294 = vmatmul.msk.f32.vlgmr.msra.gmra.mxu0 %vm514_vm1, %v923_v9 }
 0x645   : > { %v1040_v11 = vpop.f32.mrf.mxu3 }
 0x646   : > { %1314 = vmatmul.msk.f32.vlgmr.msrb.gmra.mxu0 %vm514_vm1, %v982_v58  ;;  %v1041_v12 = vadd.f32 %v1372_v23, %v1040_v11 }
 0x648   : > { %1098 = vmatpush.msrb.mxu1 %v1041_v12 }
 0x6bb   : > { %v948_v0 = vpop.f32.mrf.mxu0 }
 0x6bc   : > { %v951_v1 = vadd.f32 %v948_v0, %v773_v63 }
 0x6c3   : > { %v1066_v2 = vpop.f32.mrf.mxu0 }
 0x6c4   : > { %v1069_v3 = vsel %vm514_vm1, %v1066_v2, -inf }
 0x6c5   : > { %1070 = vmax.xlane.f32.xlu0 %v1069_v3 }
 0x738   : > { %v1071_v4 = vpop.xlane.xlu0 %1070 }
 0x739   : > { %v1072_v5 = vsub.f32 %v1066_v2, %v1071_v4 }
 0x73b   : > { %v1073_v6 = vmul.f32 1.442695, %v1072_v5 }
 0x73d   : > { %1386 = vpow2.f32 %v1073_v6 }
 0x743   : > { %v1387_v7 = vpop.eup %1386 }
 0x744   : > { %v1075_v10 = vsel %vm514_vm1, %v1387_v7, 0.0 }
 0x745   : > { %1076 = vadd.xlane.f32.xlu1 %v1075_v10 }
 0x7b8   : > { %v1077_v14 = vpop.xlane.xlu1 %1076 }
 0x7b9   : > { %1388 = vrcp.f32 %v1077_v14 }
 0x7bf   : > { %v1389_v15 = vpop.eup %1388 }
 0x7c0   : > { %v1079_v16 = vmul.f32 %v1389_v15, %v1387_v7 }
 0x7c2   : > { %1315 = vmatmul.msk.f32.vlgmr.msrb.gmra.mxu1 %vm514_vm1, %v1079_v16 }
 0x83f   : > { %v1100_v17 = vpop.f32.mrf.mxu1 }
 0x840   : > { %1317 = vmatmul.msk.f32.vlgmr.msrb.gmra.mxu2 %vm514_vm1, %v1100_v17 }
 0x8c3   : > { %v1125_v19 = vpop.f32.mrf.mxu2 }
 0x8c4   : > { %v1128_v20 = vadd.f32 %v1125_v19, %v951_v1 }
 0x8c6   : > { %v1133_v21 = vadd.f32 %v1373_v18, %v1128_v20 }
 0x8c8   : > { %1134 = vst.msk [vmem:[%s403_s15] sm:$0xff] %vm427_vm0, %v1133_v21 }
 0x8c9   : > { %1417 = shalt.err (!%p1414_p3)
}
 0x8ca   : > { %1322 = dma.vmem_to_hbm [thread:$0]  (%p1552_p5), %s1149_s22, 128, %s1151_s24, %s1136_s21  }
 0x8cb PF: > { %p1328_p4 = scmp.ge.s32.totalorder %s1452_s20, 2  ;;  %s1162_s25 = sand.u32 1, %s1440_s17  }
 0x8cc   : > { %s1163_s14 = scalar_lea.sflag [#allocation3], %s1162_s25 }
 0x8cd   : > { %p1325_p7 = pnand %p1328_p4, %p1556_p6 }
 0x8cf   : > { %p1326_p8 = pneg %p1325_p7 }
 0x8d1   : > { %1435 = dma.done.wait (%p1326_p8), %s1163_s14, 128  }
 0x8d2   : > { %1437 = vsyncadd (%p1326_p8), %s1163_s14, 4294967168  ;;  %s1880_s0 = sld [smem:[#allocation5_spill]]  ;;  %p21_p9 = scmp.ge.s32.totalorder %s1539_s23, 4  }
 0x8d3   : > { %s1881_s17 = smov %s1444_s18  ;;  %s1882_s18 = smov %s1448_s19 }
 0x8d4   : > { %s1884_s20 = smov %s1539_s23  ;;  %23 = sbr.rel (!%p21_p9) target bundleno = 5 (0x5), region = 126 }
 0x8d8   : > { %s1883_s19 = smov %s1880_s0 }
 0x8d9   :  { %1169 = vsyncpa [#allocation3], 1 }
 0x8da   :  { %1171 = vsyncpa [#allocation3 + $0x1], 1 }

</bundles_post_ra>
